<compile_context>
chip_gen: v7x
topology: tpu7x:2x2x1
jax: 0.10.0
libtpu: 0.0.40
codegen_flags: <defaults>
</compile_context>

<pallas_src>
import functools

import jax
import jax.numpy as jnp
from jax import lax
from jax.experimental import pallas as pl
from jax.experimental.pallas import tpu as pltpu


def _round_up(x, m):
    return ((x + m - 1) // m) * m


def _sigmoid(x):
    # tanh form: one EUP op per sigmoid (vs exp + reciprocal), and exact.
    return 0.5 * (jnp.tanh(0.5 * x) + 1.0)


def _choose_row_tile(m8, tm_max):
    """m8: row count already rounded to a multiple of 8.  Pick a tile that divides it."""
    if m8 <= tm_max:
        # Split into two row tiles when possible so both TensorCores get work (v7x).
        if m8 >= 16 and m8 % 16 == 0:
            return m8 // 2
        return m8
    # Prefer an exact divisor of m8 (avoids a jnp.pad round trip over the activations).
    for t in range(tm_max, 63, -8):
        if m8 % t == 0:
            return t
    return tm_max  # fallback: pad


def _choose_col_tile(n_out, tn_max):
    n128 = _round_up(n_out, 128)
    if n128 <= tn_max:
        return n128, n128
    for t in range(tn_max, 127, -128):
        if n128 % t == 0:
            return t, n128
    return tn_max, _round_up(n128, tn_max)


# --------------------------------------------------------------------------------------
# Generic tiled (M, K) @ (K, N) + bias -> f32.
# Grid is (column tiles, row tiles): the column (weight) block index only changes on the
# slow/outer axis, so the (K, tn) weight tile stays VMEM-resident across all row tiles
# and the weight matrix is streamed from HBM exactly once (key for the vocab GEMM).
# The activation operand is cast to the weight dtype (bf16) INSIDE the kernel.
# --------------------------------------------------------------------------------------
def _matmul_bias_kernel(x_ref, w_ref, b_ref, o_ref):
    o_ref[...] = (
        jnp.dot(x_ref[...].astype(w_ref.dtype), w_ref[...],
                preferred_element_type=jnp.float32)
        + b_ref[...]
    ).astype(o_ref.dtype)


def _pallas_matmul_bias(x, w, b, *, tm_max=512, tn_max=1024, out_dtype=jnp.float32):
    """x: (M, K) f32/bf16, w: (K, Nout) bf16, b: (1, Nout) f32.

    Returns the PADDED (Mp, Np) output; callers slice (identity slices are elided).
    """
    M, K = x.shape
    _, Nout = w.shape

    M8 = _round_up(M, 8)
    tm = _choose_row_tile(M8, tm_max)
    Mp = _round_up(M8, tm)
    tn, Np = _choose_col_tile(Nout, tn_max)

    if Mp != M:
        x = jnp.pad(x, ((0, Mp - M), (0, 0)))
    if Np != Nout:
        w = jnp.pad(w, ((0, 0), (0, Np - Nout)))
        b = jnp.pad(b, ((0, 0), (0, Np - Nout)))

    return pl.pallas_call(
        _matmul_bias_kernel,
        out_shape=jax.ShapeDtypeStruct((Mp, Np), out_dtype),
        grid_spec=pltpu.PrefetchScalarGridSpec(
            num_scalar_prefetch=0,
            grid=(Np // tn, Mp // tm),          # (col tiles [outer], row tiles [inner])
            in_specs=[
                pl.BlockSpec((tm, K), lambda j, i: (i, 0)),   # activations
                pl.BlockSpec((K, tn), lambda j, i: (0, j)),   # weight: resident over i
                pl.BlockSpec((1, tn), lambda j, i: (0, j)),   # bias
            ],
            out_specs=pl.BlockSpec((tm, tn), lambda j, i: (i, j)),
        ),
        compiler_params=pltpu.CompilerParams(
            dimension_semantics=("parallel", "parallel"),
            vmem_limit_bytes=32 * 1024 * 1024,
        ),
    )(x, w, b)


# --------------------------------------------------------------------------------------
# Serial LSTM recurrence.  Input gates (x @ W_ih^T + b_ih + b_hh) are precomputed, so
# each step only runs the small (N, H) x (H, 4H) recurrence matmul and the elementwise
# update.  `lb` time steps are processed per grid iteration via lax.fori_loop(unroll=True);
# h/c persist in f32 VMEM scratch across the whole sequence; hidden states stored in bf16.
# --------------------------------------------------------------------------------------
def _lstm_recurrence_kernel(xg_ref, whh_ref, out_ref, h_ref, c_ref):
    @pl.when(pl.program_id(0) == 0)
    def _():
        h_ref[...] = jnp.zeros_like(h_ref)
        c_ref[...] = jnp.zeros_like(c_ref)

    H = h_ref.shape[-1]
    Lb = out_ref.shape[0]

    def step(s, carry):
        h_prev = h_ref[...]          # (N, H) f32
        c_prev = c_ref[...]          # (N, H) f32

        # Bias already folded into the precomputed x-projection.
        gates = xg_ref[s] + jnp.dot(
            h_prev.astype(whh_ref.dtype), whh_ref[...],
            preferred_element_type=jnp.float32,
        )  # (N, 4H) f32

        i_g = _sigmoid(gates[:, 0 * H:1 * H])
        f_g = _sigmoid(gates[:, 1 * H:2 * H])
        g_g = jnp.tanh(gates[:, 2 * H:3 * H])
        o_g = _sigmoid(gates[:, 3 * H:4 * H])

        c_new = f_g * c_prev + i_g * g_g
        h_new = o_g * jnp.tanh(c_new)

        c_ref[...] = c_new
        h_ref[...] = h_new
        out_ref[s] = h_new.astype(out_ref.dtype)
        return carry

    lax.fori_loop(0, Lb, step, None, unroll=True)


def _pallas_lstm_recurrence(x_gates, w_hh_T, *, lb, out_dtype):
    """x_gates: (Lp, Np, 4H) f32 (already padded: lb | Lp, 8 | Np), w_hh_T: (H, 4H) bf16.

    Returns hidden states (Lp, Np, H) in `out_dtype`.
    """
    Lp, Np, G = x_gates.shape
    H = w_hh_T.shape[0]
    assert Lp % lb == 0 and Np % 8 == 0

    return pl.pallas_call(
        _lstm_recurrence_kernel,
        out_shape=jax.ShapeDtypeStruct((Lp, Np, H), out_dtype),
        grid_spec=pltpu.PrefetchScalarGridSpec(
            num_scalar_prefetch=0,
            grid=(Lp // lb,),
            in_specs=[
                pl.BlockSpec((lb, Np, G), lambda t: (t, 0, 0)),   # precomputed gates
                pl.BlockSpec((H, G), lambda t: (0, 0)),           # W_hh^T (tiny, resident)
            ],
            out_specs=pl.BlockSpec((lb, Np, H), lambda t: (t, 0, 0)),
            scratch_shapes=[
                pltpu.VMEM((Np, H), jnp.float32),   # h state (persists across grid)
                pltpu.VMEM((Np, H), jnp.float32),   # c state
            ],
        ),
        compiler_params=pltpu.CompilerParams(
            dimension_semantics=("arbitrary",),      # sequential recurrence
        ),
    )(x_gates, w_hh_T)


# --------------------------------------------------------------------------------------
# Full forward pass
# --------------------------------------------------------------------------------------
def caption_decoder_forward(features, captions, params, *, lb=8,
                            matmul_dtype=jnp.bfloat16):
    """features: (B, E) float32, captions: (B, T) int32 -> logits (B, T+1, V) float32."""
    W_emb = params["W_emb"]                          # (V, E) f32
    W_ih_T = params["W_ih_T"].astype(matmul_dtype)   # (E, 4H) -- small one-time casts
    W_hh_T = params["W_hh_T"].astype(matmul_dtype)   # (H, 4H)
    W_fc_T = params["W_fc_T"].astype(matmul_dtype)   # (H, V)
    b_gates = params["b_gates"]                      # (1, 4H) f32 = b_ih + b_hh
    b_fc = params["b_fc"]                            # (1, V)  f32

    # TODO(synk): fuse the embedding gather + feature concat into phase 1 via
    # scalar-prefetched caption ids + an in-kernel row gather; kept as plain-JAX glue.
    emb = jnp.take(W_emb, captions, axis=0)                        # (B, T, E)
    inputs = jnp.concatenate([features[:, None, :], emb], axis=1)  # (B, T+1, E)

    # nn.LSTM default batch_first=False: dim0 (=B) is the time axis, dim1 (=T+1) the
    # batch axis -- reproduced exactly.
    L, N, E = inputs.shape
    H = params["W_hh_T"].shape[0]
    V = params["W_fc_T"].shape[1]
    G = 4 * H

    # One up-front pad to grid-friendly shapes; padded rows/steps evolve independently
    # and are sliced off ONCE at the very end (intermediate slices below are identity).
    Lb = max(1, min(lb, L))
    Lp = _round_up(L, Lb)
    Np = _round_up(N, 8)
    if (Lp, Np) != (L, N):
        inputs = jnp.pad(inputs, ((0, Lp - L), (0, Np - N), (0, 0)))

    # Phase 1: hoisted input projection for the whole sequence (bias folded in);
    # f32 activations go in, bf16 cast happens inside the kernel.
    xg = _pallas_matmul_bias(inputs.reshape(Lp * Np, E), W_ih_T, b_gates,
                             tm_max=512, tn_max=1024)
    xg = xg[:Lp * Np, :G].reshape(Lp, Np, G)         # identity slice unless padded

    # Phase 2: serial recurrence; hidden states emitted in bf16 (phase 3 consumes bf16).
    hs = _pallas_lstm_recurrence(xg, W_hh_T, lb=Lb, out_dtype=matmul_dtype)

    # Phase 3: vocab projection; weight-resident grid ordering, f32 logits.
    logits = _pallas_matmul_bias(hs.reshape(Lp * Np, H), W_fc_T, b_fc,
                                 tm_max=512, tn_max=1024)
    Vp = logits.shape[1]
    logits = logits[:Lp * Np, :].reshape(Lp, Np, Vp)[:L, :N, :V]   # single real slice
    return logits                                     # (B, T+1, V)


# --------------------------------------------------------------------------------------
# Pure-JAX reference mirroring PyTorch f32 semantics (for verification)
# --------------------------------------------------------------------------------------
def _reference_forward(features, captions, params):
    W_emb = params["W_emb"]
    W_ih_T, W_hh_T = params["W_ih_T"], params["W_hh_T"]
    b_gates = params["b_gates"]
    W_fc_T, b_fc = params["W_fc_T"], params["b_fc"]

    emb = jnp.take(W_emb, captions, axis=0)
    inputs = jnp.concatenate([features[:, None, :], emb], axis=1)  # (L, N, E)
    L, N, _ = inputs.shape
    H = W_hh_T.shape[0]

    def step(carry, x_t):
        h, c = carry
        gates = x_t @ W_ih_T + h @ W_hh_T + b_gates
        i = jax.nn.sigmoid(gates[:, 0 * H:1 * H])
        f = jax.nn.sigmoid(gates[:, 1 * H:2 * H])
        g = jnp.tanh(gates[:, 2 * H:3 * H])
        o = jax.nn.sigmoid(gates[:, 3 * H:4 * H])
        c = f * c + i * g
        h = o * jnp.tanh(c)
        return (h, c), h

    h0 = jnp.zeros((N, H), jnp.float32)
    c0 = jnp.zeros((N, H), jnp.float32)
    _, hs = jax.lax.scan(step, (h0, c0), inputs)     # (L, N, H)
    return hs @ W_fc_T + b_fc                        # (L, N, V)


def init_params(key, embed_size, hidden_size, vocab_size):
    ks = jax.random.split(key, 7)
    s = 0.1
    W_emb = s * jax.random.normal(ks[0], (vocab_size, embed_size), jnp.float32)
    # PyTorch stores W_ih as (4H, E); keep it pre-transposed for the kernels.
    W_ih_T = s * jax.random.normal(ks[1], (embed_size, 4 * hidden_size), jnp.float32)
    W_hh_T = s * jax.random.normal(ks[2], (hidden_size, 4 * hidden_size), jnp.float32)
    b_ih = s * jax.random.normal(ks[3], (4 * hidden_size,), jnp.float32)
    b_hh = s * jax.random.normal(ks[4], (4 * hidden_size,), jnp.float32)
    W_fc_T = s * jax.random.normal(ks[5], (hidden_size, vocab_size), jnp.float32)
    b_fc = s * jax.random.normal(ks[6], (vocab_size,), jnp.float32)
    return {
        "W_emb": W_emb,
        "W_ih_T": W_ih_T,
        "W_hh_T": W_hh_T,
        "b_gates": (b_ih + b_hh).reshape(1, -1),
        "W_fc_T": W_fc_T,
        "b_fc": b_fc.reshape(1, -1),
    }


if __name__ == "__main__":
    # Small deterministic example; dims chosen lane-aligned (E=H=128, V=256).
    B, T = 2, 8
    embed_size, hidden_size, vocab_size = 128, 128, 256

    key = jax.random.PRNGKey(0)
    kp, kf, kc = jax.random.split(key, 3)

    params = init_params(kp, embed_size, hidden_size, vocab_size)
    features = jax.random.normal(kf, (B, embed_size), jnp.float32)
    captions = jax.random.randint(kc, (B, T), 0, vocab_size, jnp.int32)

    fwd = jax.jit(functools.partial(caption_decoder_forward, lb=8))
    out = jax.block_until_ready(fwd(features, captions, params))
    assert out.shape == (B, T + 1, vocab_size), out.shape

    ref = jax.block_until_ready(_reference_forward(features, captions, params))
    # bf16 MXU operands (f32 accumulation) vs f32 reference -> slightly looser tolerance.
    max_err = float(jnp.max(jnp.abs(out - ref)))
    assert jnp.allclose(out, ref, atol=3e-2, rtol=3e-2), max_err

    print("KERNEL_OK")
</pallas_src>

<mosaic_0001>
module attributes {stable_mosaic.version = 11 : i64} {
  func.func @_matmul_bias_kernel(%arg0: i32, %arg1: i32, %arg2: memref<16x128xf32, #tpu.memory_space<vmem>>, %arg3: memref<128x512xbf16, #tpu.memory_space<vmem>>, %arg4: memref<1x512xf32, #tpu.memory_space<vmem>>, %arg5: memref<16x512xf32, #tpu.memory_space<vmem>>) attributes {dimension_semantics = [#tpu.dimension_semantics<parallel>, #tpu.dimension_semantics<parallel>], iteration_bounds = array<i64: 1, 2>, scalar_prefetch = 0 : i64, scratch_operands = 0 : i64, tpu.core_type = #tpu.core_type<tc>, window_params = [{transform_indices = @transform_0, window_bounds = array<i64: 16, 128>}, {transform_indices = @transform_1, window_bounds = array<i64: 128, 512>}, {transform_indices = @transform_2, window_bounds = array<i64: 1, 512>}, {transform_indices = @transform_3, window_bounds = array<i64: 16, 512>}]} {
    %c0 = arith.constant 0 : index
    %c0_0 = arith.constant 0 : index
    %0 = vector.load %arg2[%c0, %c0_0] : memref<16x128xf32, #tpu.memory_space<vmem>>, vector<16x128xf32>
    %1 = arith.truncf %0 : vector<16x128xf32> to vector<16x128xbf16>
    %c0_1 = arith.constant 0 : index
    %c0_2 = arith.constant 0 : index
    %2 = vector.load %arg3[%c0_1, %c0_2] : memref<128x512xbf16, #tpu.memory_space<vmem>>, vector<128x512xbf16>
    %cst = arith.constant dense<0.000000e+00> : vector<16x512xf32>
    %3 = tpu.matmul %1, %2, %cst {dimension_numbers = #tpu.dot_dimension_numbers<[1], [0], [0], [1], [0, 0, 1, 1], [], []>} : vector<16x128xbf16>, vector<128x512xbf16>, vector<16x512xf32> -> vector<16x512xf32>
    %c0_3 = arith.constant 0 : index
    %c0_4 = arith.constant 0 : index
    %4 = vector.load %arg4[%c0_3, %c0_4] : memref<1x512xf32, #tpu.memory_space<vmem>>, vector<1x512xf32>
    %5 = vector.broadcast %4 : vector<1x512xf32> to vector<16x512xf32>
    %6 = arith.addf %3, %5 : vector<16x512xf32>
    %c0_5 = arith.constant 0 : index
    %c0_6 = arith.constant 0 : index
    %7 = vector.load %arg5[%c0_5, %c0_6] : memref<16x512xf32, #tpu.memory_space<vmem>>, vector<16x512xf32>
    tpu.vector_store %arg5[%c0_5, %c0_6], %6 {strides = array<i32>} : memref<16x512xf32, #tpu.memory_space<vmem>>, vector<16x512xf32>,
    return
  }
  func.func @transform_0(%arg0: i32, %arg1: i32) -> (i32, i32) {
    %c0_i32 = arith.constant 0 : i32
    %c0_i32_0 = arith.constant 0 : i32
    return %arg1, %c0_i32 : i32, i32
  }
  func.func @transform_1(%arg0: i32, %arg1: i32) -> (i32, i32) {
    %c0_i32 = arith.constant 0 : i32
    %c0_i32_0 = arith.constant 0 : i32
    return %c0_i32, %arg0 : i32, i32
  }
  func.func @transform_2(%arg0: i32, %arg1: i32) -> (i32, i32) {
    %c0_i32 = arith.constant 0 : i32
    %c0_i32_0 = arith.constant 0 : i32
    return %c0_i32, %arg0 : i32, i32
  }
  func.func @transform_3(%arg0: i32, %arg1: i32) -> (i32, i32) {
    %c0_i32 = arith.constant 0 : i32
    return %arg1, %arg0 : i32, i32
  }
}

module attributes {stable_mosaic.version = 11 : i64} {
  func.func @_lstm_recurrence_kernel(%arg0: i32, %arg1: memref<2x16x512xf32, #tpu.memory_space<vmem>>, %arg2: memref<128x512xbf16, #tpu.memory_space<vmem>>, %arg3: memref<2x16x128xbf16, #tpu.memory_space<vmem>>, %arg4: memref<16x128xf32, #tpu.memory_space<vmem>>, %arg5: memref<16x128xf32, #tpu.memory_space<vmem>>) attributes {dimension_semantics = [#tpu.dimension_semantics<arbitrary>], iteration_bounds = array<i64: 1>, scalar_prefetch = 0 : i64, scratch_operands = 2 : i64, tpu.core_type = #tpu.core_type<tc>, window_params = [{transform_indices = @transform_0, window_bounds = array<i64: 2, 16, 512>}, {pipeline_mode = #tpu.pipeline_mode<synchronous>, transform_indices = @transform_1, window_bounds = array<i64: 128, 512>}, {transform_indices = @transform_2, window_bounds = array<i64: 2, 16, 128>}]} {
    %c0_i32 = arith.constant 0 : i32
    %0 = arith.cmpi eq, %arg0, %c0_i32 : i32
    %1 = arith.extui %0 : i1 to i32
    %c0_i32_0 = arith.constant 0 : i32
    %2 = arith.cmpi ne, %1, %c0_i32_0 : i32
    scf.if %2 {
      %cst_48 = arith.constant 0.000000e+00 : f32
      %97 = vector.broadcast %cst_48 : f32 to vector<16x128xf32>
      %c0_49 = arith.constant 0 : index
      %c0_50 = arith.constant 0 : index
      %98 = vector.load %arg4[%c0_49, %c0_50] : memref<16x128xf32, #tpu.memory_space<vmem>>, vector<16x128xf32>
      tpu.vector_store %arg4[%c0_49, %c0_50], %97 {strides = array<i32>} : memref<16x128xf32, #tpu.memory_space<vmem>>, vector<16x128xf32>,
      %cst_51 = arith.constant 0.000000e+00 : f32
      %99 = vector.broadcast %cst_51 : f32 to vector<16x128xf32>
      %c0_52 = arith.constant 0 : index
      %c0_53 = arith.constant 0 : index
      %100 = vector.load %arg5[%c0_52, %c0_53] : memref<16x128xf32, #tpu.memory_space<vmem>>, vector<16x128xf32>
      tpu.vector_store %arg5[%c0_52, %c0_53], %99 {strides = array<i32>} : memref<16x128xf32, #tpu.memory_space<vmem>>, vector<16x128xf32>,
    } else {
    }
    %c0_i32_1 = arith.constant 0 : i32
    %c0 = arith.constant 0 : index
    %c0_2 = arith.constant 0 : index
    %3 = vector.load %arg4[%c0, %c0_2] : memref<16x128xf32, #tpu.memory_space<vmem>>, vector<16x128xf32>
    %c0_3 = arith.constant 0 : index
    %c0_4 = arith.constant 0 : index
    %4 = vector.load %arg5[%c0_3, %c0_4] : memref<16x128xf32, #tpu.memory_space<vmem>>, vector<16x128xf32>
    %5 = arith.index_cast %c0_i32_1 : i32 to index
    %c0_5 = arith.constant 0 : index
    %c0_6 = arith.constant 0 : index
    %6 = vector.load %arg1[%5, %c0_5, %c0_6] : memref<2x16x512xf32, #tpu.memory_space<vmem>>, vector<1x16x512xf32>
    %7 = vector.shape_cast %6 : vector<1x16x512xf32> to vector<16x512xf32>
    %8 = arith.truncf %3 : vector<16x128xf32> to vector<16x128xbf16>
    %c0_7 = arith.constant 0 : index
    %c0_8 = arith.constant 0 : index
    %9 = vector.load %arg2[%c0_7, %c0_8] : memref<128x512xbf16, #tpu.memory_space<vmem>>, vector<128x512xbf16>
    %cst = arith.constant dense<0.000000e+00> : vector<16x512xf32>
    %10 = tpu.matmul %8, %9, %cst {dimension_numbers = #tpu.dot_dimension_numbers<[1], [0], [0], [1], [0, 0, 1, 1], [], []>} : vector<16x128xbf16>, vector<128x512xbf16>, vector<16x512xf32> -> vector<16x512xf32>
    %11 = arith.addf %7, %10 : vector<16x512xf32>
    %12 = vector.extract_strided_slice %11 {offsets = [0, 0], sizes = [16, 128], strides = [1, 1]} : vector<16x512xf32> to vector<16x128xf32>
    %cst_9 = arith.constant 5.000000e-01 : f32
    %13 = vector.broadcast %cst_9 : f32 to vector<16x128xf32>
    %14 = arith.mulf %13, %12 : vector<16x128xf32>
    %15 = math.tanh %14 : vector<16x128xf32>
    %cst_10 = arith.constant 1.000000e+00 : f32
    %16 = vector.broadcast %cst_10 : f32 to vector<16x128xf32>
    %17 = arith.addf %15, %16 : vector<16x128xf32>
    %cst_11 = arith.constant 5.000000e-01 : f32
    %18 = vector.broadcast %cst_11 : f32 to vector<16x128xf32>
    %19 = arith.mulf %18, %17 : vector<16x128xf32>
    %20 = vector.extract_strided_slice %11 {offsets = [0, 128], sizes = [16, 128], strides = [1, 1]} : vector<16x512xf32> to vector<16x128xf32>
    %cst_12 = arith.constant 5.000000e-01 : f32
    %21 = vector.broadcast %cst_12 : f32 to vector<16x128xf32>
    %22 = arith.mulf %21, %20 : vector<16x128xf32>
    %23 = math.tanh %22 : vector<16x128xf32>
    %cst_13 = arith.constant 1.000000e+00 : f32
    %24 = vector.broadcast %cst_13 : f32 to vector<16x128xf32>
    %25 = arith.addf %23, %24 : vector<16x128xf32>
    %cst_14 = arith.constant 5.000000e-01 : f32
    %26 = vector.broadcast %cst_14 : f32 to vector<16x128xf32>
    %27 = arith.mulf %26, %25 : vector<16x128xf32>
    %28 = vector.extract_strided_slice %11 {offsets = [0, 256], sizes = [16, 128], strides = [1, 1]} : vector<16x512xf32> to vector<16x128xf32>
    %29 = math.tanh %28 : vector<16x128xf32>
    %30 = vector.extract_strided_slice %11 {offsets = [0, 384], sizes = [16, 128], strides = [1, 1]} : vector<16x512xf32> to vector<16x128xf32>
    %cst_15 = arith.constant 5.000000e-01 : f32
    %31 = vector.broadcast %cst_15 : f32 to vector<16x128xf32>
    %32 = arith.mulf %31, %30 : vector<16x128xf32>
    %33 = math.tanh %32 : vector<16x128xf32>
    %cst_16 = arith.constant 1.000000e+00 : f32
    %34 = vector.broadcast %cst_16 : f32 to vector<16x128xf32>
    %35 = arith.addf %33, %34 : vector<16x128xf32>
    %cst_17 = arith.constant 5.000000e-01 : f32
    %36 = vector.broadcast %cst_17 : f32 to vector<16x128xf32>
    %37 = arith.mulf %36, %35 : vector<16x128xf32>
    %38 = arith.mulf %27, %4 : vector<16x128xf32>
    %39 = arith.mulf %19, %29 : vector<16x128xf32>
    %40 = arith.addf %38, %39 : vector<16x128xf32>
    %41 = math.tanh %40 : vector<16x128xf32>
    %42 = arith.mulf %37, %41 : vector<16x128xf32>
    %c0_18 = arith.constant 0 : index
    %c0_19 = arith.constant 0 : index
    %43 = vector.load %arg5[%c0_18, %c0_19] : memref<16x128xf32, #tpu.memory_space<vmem>>, vector<16x128xf32>
    tpu.vector_store %arg5[%c0_18, %c0_19], %40 {strides = array<i32>} : memref<16x128xf32, #tpu.memory_space<vmem>>, vector<16x128xf32>,
    %c0_20 = arith.constant 0 : index
    %c0_21 = arith.constant 0 : index
    %44 = vector.load %arg4[%c0_20, %c0_21] : memref<16x128xf32, #tpu.memory_space<vmem>>, vector<16x128xf32>
    tpu.vector_store %arg4[%c0_20, %c0_21], %42 {strides = array<i32>} : memref<16x128xf32, #tpu.memory_space<vmem>>, vector<16x128xf32>,
    %45 = arith.truncf %42 : vector<16x128xf32> to vector<16x128xbf16>
    %46 = arith.index_cast %c0_i32_1 : i32 to index
    %c0_22 = arith.constant 0 : index
    %c0_23 = arith.constant 0 : index
    %47 = vector.load %arg3[%46, %c0_22, %c0_23] : memref<2x16x128xbf16, #tpu.memory_space<vmem>>, vector<1x16x128xbf16>
    %48 = vector.shape_cast %47 : vector<1x16x128xbf16> to vector<16x128xbf16>
    %49 = vector.shape_cast %45 : vector<16x128xbf16> to vector<1x16x128xbf16>
    tpu.vector_store %arg3[%46, %c0_22, %c0_23], %49 {strides = array<i32>} : memref<2x16x128xbf16, #tpu.memory_space<vmem>>, vector<1x16x128xbf16>,
    %c1_i32 = arith.constant 1 : i32
    %c0_24 = arith.constant 0 : index
    %c0_25 = arith.constant 0 : index
    %50 = vector.load %arg4[%c0_24, %c0_25] : memref<16x128xf32, #tpu.memory_space<vmem>>, vector<16x128xf32>
    %c0_26 = arith.constant 0 : index
    %c0_27 = arith.constant 0 : index
    %51 = vector.load %arg5[%c0_26, %c0_27] : memref<16x128xf32, #tpu.memory_space<vmem>>, vector<16x128xf32>
    %52 = arith.index_cast %c1_i32 : i32 to index
    %c0_28 = arith.constant 0 : index
    %c0_29 = arith.constant 0 : index
    %53 = vector.load %arg1[%52, %c0_28, %c0_29] : memref<2x16x512xf32, #tpu.memory_space<vmem>>, vector<1x16x512xf32>
    %54 = vector.shape_cast %53 : vector<1x16x512xf32> to vector<16x512xf32>
    %55 = arith.truncf %50 : vector<16x128xf32> to vector<16x128xbf16>
    %c0_30 = arith.constant 0 : index
    %c0_31 = arith.constant 0 : index
    %56 = vector.load %arg2[%c0_30, %c0_31] : memref<128x512xbf16, #tpu.memory_space<vmem>>, vector<128x512xbf16>
    %cst_32 = arith.constant dense<0.000000e+00> : vector<16x512xf32>
    %57 = tpu.matmul %55, %56, %cst_32 {dimension_numbers = #tpu.dot_dimension_numbers<[1], [0], [0], [1], [0, 0, 1, 1], [], []>} : vector<16x128xbf16>, vector<128x512xbf16>, vector<16x512xf32> -> vector<16x512xf32>
    %58 = arith.addf %54, %57 : vector<16x512xf32>
    %59 = vector.extract_strided_slice %58 {offsets = [0, 0], sizes = [16, 128], strides = [1, 1]} : vector<16x512xf32> to vector<16x128xf32>
    %cst_33 = arith.constant 5.000000e-01 : f32
    %60 = vector.broadcast %cst_33 : f32 to vector<16x128xf32>
    %61 = arith.mulf %60, %59 : vector<16x128xf32>
    %62 = math.tanh %61 : vector<16x128xf32>
    %cst_34 = arith.constant 1.000000e+00 : f32
    %63 = vector.broadcast %cst_34 : f32 to vector<16x128xf32>
    %64 = arith.addf %62, %63 : vector<16x128xf32>
    %cst_35 = arith.constant 5.000000e-01 : f32
    %65 = vector.broadcast %cst_35 : f32 to vector<16x128xf32>
    %66 = arith.mulf %65, %64 : vector<16x128xf32>
    %67 = vector.extract_strided_slice %58 {offsets = [0, 128], sizes = [16, 128], strides = [1, 1]} : vector<16x512xf32> to vector<16x128xf32>
    %cst_36 = arith.constant 5.000000e-01 : f32
    %68 = vector.broadcast %cst_36 : f32 to vector<16x128xf32>
    %69 = arith.mulf %68, %67 : vector<16x128xf32>
    %70 = math.tanh %69 : vector<16x128xf32>
    %cst_37 = arith.constant 1.000000e+00 : f32
    %71 = vector.broadcast %cst_37 : f32 to vector<16x128xf32>
    %72 = arith.addf %70, %71 : vector<16x128xf32>
    %cst_38 = arith.constant 5.000000e-01 : f32
    %73 = vector.broadcast %cst_38 : f32 to vector<16x128xf32>
    %74 = arith.mulf %73, %72 : vector<16x128xf32>
    %75 = vector.extract_strided_slice %58 {offsets = [0, 256], sizes = [16, 128], strides = [1, 1]} : vector<16x512xf32> to vector<16x128xf32>
    %76 = math.tanh %75 : vector<16x128xf32>
    %77 = vector.extract_strided_slice %58 {offsets = [0, 384], sizes = [16, 128], strides = [1, 1]} : vector<16x512xf32> to vector<16x128xf32>
    %cst_39 = arith.constant 5.000000e-01 : f32
    %78 = vector.broadcast %cst_39 : f32 to vector<16x128xf32>
    %79 = arith.mulf %78, %77 : vector<16x128xf32>
    %80 = math.tanh %79 : vector<16x128xf32>
    %cst_40 = arith.constant 1.000000e+00 : f32
    %81 = vector.broadcast %cst_40 : f32 to vector<16x128xf32>
    %82 = arith.addf %80, %81 : vector<16x128xf32>
    %cst_41 = arith.constant 5.000000e-01 : f32
    %83 = vector.broadcast %cst_41 : f32 to vector<16x128xf32>
    %84 = arith.mulf %83, %82 : vector<16x128xf32>
    %85 = arith.mulf %74, %51 : vector<16x128xf32>
    %86 = arith.mulf %66, %76 : vector<16x128xf32>
    %87 = arith.addf %85, %86 : vector<16x128xf32>
    %88 = math.tanh %87 : vector<16x128xf32>
    %89 = arith.mulf %84, %88 : vector<16x128xf32>
    %c0_42 = arith.constant 0 : index
    %c0_43 = arith.constant 0 : index
    %90 = vector.load %arg5[%c0_42, %c0_43] : memref<16x128xf32, #tpu.memory_space<vmem>>, vector<16x128xf32>
    tpu.vector_store %arg5[%c0_42, %c0_43], %87 {strides = array<i32>} : memref<16x128xf32, #tpu.memory_space<vmem>>, vector<16x128xf32>,
    %c0_44 = arith.constant 0 : index
    %c0_45 = arith.constant 0 : index
    %91 = vector.load %arg4[%c0_44, %c0_45] : memref<16x128xf32, #tpu.memory_space<vmem>>, vector<16x128xf32>
    tpu.vector_store %arg4[%c0_44, %c0_45], %89 {strides = array<i32>} : memref<16x128xf32, #tpu.memory_space<vmem>>, vector<16x128xf32>,
    %92 = arith.truncf %89 : vector<16x128xf32> to vector<16x128xbf16>
    %93 = arith.index_cast %c1_i32 : i32 to index
    %c0_46 = arith.constant 0 : index
    %c0_47 = arith.constant 0 : index
    %94 = vector.load %arg3[%93, %c0_46, %c0_47] : memref<2x16x128xbf16, #tpu.memory_space<vmem>>, vector<1x16x128xbf16>
    %95 = vector.shape_cast %94 : vector<1x16x128xbf16> to vector<16x128xbf16>
    %96 = vector.shape_cast %92 : vector<16x128xbf16> to vector<1x16x128xbf16>
    tpu.vector_store %arg3[%93, %c0_46, %c0_47], %96 {strides = array<i32>} : memref<2x16x128xbf16, #tpu.memory_space<vmem>>, vector<1x16x128xbf16>,
    %c2_i32 = arith.constant 2 : i32
    return
  }
  func.func @transform_0(%arg0: i32) -> (i32, i32, i32) {
    %c0_i32 = arith.constant 0 : i32
    %c0_i32_0 = arith.constant 0 : i32
    %c0_i32_1 = arith.constant 0 : i32
    return %arg0, %c0_i32, %c0_i32_0 : i32, i32, i32
  }
  func.func @transform_1(%arg0: i32) -> (i32, i32) {
    %c0_i32 = arith.constant 0 : i32
    %c0_i32_0 = arith.constant 0 : i32
    %c0_i32_1 = arith.constant 0 : i32
    return %c0_i32, %c0_i32_0 : i32, i32
  }
  func.func @transform_2(%arg0: i32) -> (i32, i32, i32) {
    %c0_i32 = arith.constant 0 : i32
    %c0_i32_0 = arith.constant 0 : i32
    %c0_i32_1 = arith.constant 0 : i32
    return %arg0, %c0_i32, %c0_i32_0 : i32, i32, i32
  }
}

module attributes {stable_mosaic.version = 11 : i64} {
  func.func @_matmul_bias_kernel(%arg0: i32, %arg1: i32, %arg2: memref<16x128xbf16, #tpu.memory_space<vmem>>, %arg3: memref<128x256xbf16, #tpu.memory_space<vmem>>, %arg4: memref<1x256xf32, #tpu.memory_space<vmem>>, %arg5: memref<16x256xf32, #tpu.memory_space<vmem>>) attributes {dimension_semantics = [#tpu.dimension_semantics<parallel>, #tpu.dimension_semantics<parallel>], iteration_bounds = array<i64: 1, 2>, scalar_prefetch = 0 : i64, scratch_operands = 0 : i64, tpu.core_type = #tpu.core_type<tc>, window_params = [{transform_indices = @transform_0, window_bounds = array<i64: 16, 128>}, {transform_indices = @transform_1, window_bounds = array<i64: 128, 256>}, {transform_indices = @transform_2, window_bounds = array<i64: 1, 256>}, {transform_indices = @transform_3, window_bounds = array<i64: 16, 256>}]} {
    %c0 = arith.constant 0 : index
    %c0_0 = arith.constant 0 : index
    %0 = vector.load %arg2[%c0, %c0_0] : memref<16x128xbf16, #tpu.memory_space<vmem>>, vector<16x128xbf16>
    %c0_1 = arith.constant 0 : index
    %c0_2 = arith.constant 0 : index
    %1 = vector.load %arg3[%c0_1, %c0_2] : memref<128x256xbf16, #tpu.memory_space<vmem>>, vector<128x256xbf16>
    %cst = arith.constant dense<0.000000e+00> : vector<16x256xf32>
    %2 = tpu.matmul %0, %1, %cst {dimension_numbers = #tpu.dot_dimension_numbers<[1], [0], [0], [1], [0, 0, 1, 1], [], []>} : vector<16x128xbf16>, vector<128x256xbf16>, vector<16x256xf32> -> vector<16x256xf32>
    %c0_3 = arith.constant 0 : index
    %c0_4 = arith.constant 0 : index
    %3 = vector.load %arg4[%c0_3, %c0_4] : memref<1x256xf32, #tpu.memory_space<vmem>>, vector<1x256xf32>
    %4 = vector.broadcast %3 : vector<1x256xf32> to vector<16x256xf32>
    %5 = arith.addf %2, %4 : vector<16x256xf32>
    %c0_5 = arith.constant 0 : index
    %c0_6 = arith.constant 0 : index
    %6 = vector.load %arg5[%c0_5, %c0_6] : memref<16x256xf32, #tpu.memory_space<vmem>>, vector<16x256xf32>
    tpu.vector_store %arg5[%c0_5, %c0_6], %5 {strides = array<i32>} : memref<16x256xf32, #tpu.memory_space<vmem>>, vector<16x256xf32>,
    return
  }
  func.func @transform_0(%arg0: i32, %arg1: i32) -> (i32, i32) {
    %c0_i32 = arith.constant 0 : i32
    %c0_i32_0 = arith.constant 0 : i32
    return %arg1, %c0_i32 : i32, i32
  }
  func.func @transform_1(%arg0: i32, %arg1: i32) -> (i32, i32) {
    %c0_i32 = arith.constant 0 : i32
    %c0_i32_0 = arith.constant 0 : i32
    return %c0_i32, %arg0 : i32, i32
  }
  func.func @transform_2(%arg0: i32, %arg1: i32) -> (i32, i32) {
    %c0_i32 = arith.constant 0 : i32
    %c0_i32_0 = arith.constant 0 : i32
    return %c0_i32, %arg0 : i32, i32
  }
  func.func @transform_3(%arg0: i32, %arg1: i32) -> (i32, i32) {
    %c0_i32 = arith.constant 0 : i32
    return %arg1, %arg0 : i32, i32
  }
}

</mosaic_0001>

<bundles_post_ra>
// kernel: caption_decoder_forward.3
= control target key start
LH: loop header
LB: loop body
LE: loop exit
PB: predicated region body
PF: predicated region fallthrough
CT: control target
= control target key end

     0   :  { %s828_s12 = smov 0   ;;  %s830_s13 = smov 0   ;;  %s967_s0 = inlined_call_operand.vmem [shape: f32[32,128], index: 0, kind: input, shape index: {}]   ;;  %s968_s1 = inlined_call_operand.vmem [shape: bf16[128,512], index: 1, kind: input, shape index: {}]   ;;  %s969_s2 = inlined_call_operand.vmem [shape: f32[1,512], index: 2, kind: input, shape index: {}]   ;;  %s970_s3 = inlined_call_operand.vmem [shape: f32[32,512], index: 3, kind: output, shape index: {}]  }
   0x1   :  { %s832_s14 = smov 0  }
   0x2 LB: > { %s22_s15 = sadd.s32 1, %s801_s13  ;;  %p669_p0 = scmp.ge.s32.totalorder %s805_s14, 1  ;;  %s805_s14 = sphi %s832_s14, %s13_s14   ;;  %s801_s13 = sphi %s830_s13, %s972_s13   ;;  %s797_s12 = sphi %s828_s12, %s971_s12  }
   0x3   : > { %p23_p1 = scmp.ge.s32.totalorder %s22_s15, 2  ;;  %p173_p2 = scmp.lt.s32.totalorder %s805_s14, 3 }
   0x5   : > { %s974_s15 = smov (%p23_p1, %s22_s15), 0  ;;  %p174_p3 = pnand %p669_p0, %p173_p2 }
   0x6   : > { %v735_v0 = vld [vmem:[%s968_s1 + $0x4] ss:$16 sps:$4 sm:$0xff] (!%p174_p3)   ;;  %v737_v1 = vld [vmem:[%s968_s1 + $0xc] ss:$16 sps:$4 sm:$0xff] (!%p174_p3)   ;;  %v807_v2 = vmov (!%p174_p3), 0   ;;  %s670_s23 = sshll.u32 (!%p174_p3), %s797_s12, 1  ;;  %v278_v36 = vlaneseq (!%p174_p3) }
   0x7   : > { %177 = sbr.rel (%p174_p3) target bundleno = 258 (0x102), region = 32  ;;  %490 = vmatprep.mubr.bf16.mxu0 (!%p174_p3), %v807_v2  ;;  %533 = vmatprep.mubr.bf16.mxu1 (!%p174_p3), %v807_v2  ;;  %v739_v3 = vld [vmem:[%s968_s1] ss:$16 sps:$4 sm:$0xff] (!%p174_p3)   ;;  %v740_v4 = vld [vmem:[%s968_s1 + $0x8] ss:$16 sps:$4 sm:$0xff] (!%p174_p3)   ;;  %p212_p4 = scmp.lt.s32.totalorder (!%p174_p3), %s670_s23, 3 }
   0x8   : > { %458 = vmatprep.subr.bf16.mxu0 (!%p174_p3), %v735_v0  ;;  %501 = vmatprep.subr.bf16.mxu1 (!%p174_p3), %v737_v1  ;;  %v741_v5 = vld [vmem:[%s968_s1 + $0x24] ss:$16 sps:$4 sm:$0xff] (!%p174_p3)   ;;  %v743_v6 = vld [vmem:[%s968_s1 + $0x2c] ss:$16 sps:$4 sm:$0xff] (!%p174_p3)   ;;  %v745_v7 = vld [vmem:[%s968_s1 + $0x20] ss:$16 sps:$4 sm:$0xff] (!%p174_p3)  }
   0x9   : > { %459 = vmatpush1.bf16.msra.mxu0 (!%p174_p3), %v739_v3  ;;  %502 = vmatpush1.bf16.msra.mxu1 (!%p174_p3), %v740_v4  ;;  %v746_v8 = vld [vmem:[%s968_s1 + $0x28] ss:$16 sps:$4 sm:$0xff] (!%p174_p3)   ;;  %v747_v9 = vld [vmem:[%s968_s1 + $0x44] ss:$16 sps:$4 sm:$0xff] (!%p174_p3)   ;;  %v749_v10 = vld [vmem:[%s968_s1 + $0x4c] ss:$16 sps:$4 sm:$0xff] (!%p174_p3)  }
   0xa   : > { %460 = vmatprep.subr.bf16.mxu0 (!%p174_p3), %v741_v5  ;;  %503 = vmatprep.subr.bf16.mxu1 (!%p174_p3), %v743_v6  ;;  %v751_v11 = vld [vmem:[%s968_s1 + $0x40] ss:$16 sps:$4 sm:$0xff] (!%p174_p3)   ;;  %v752_v12 = vld [vmem:[%s968_s1 + $0x48] ss:$16 sps:$4 sm:$0xff] (!%p174_p3)   ;;  %v753_v13 = vld [vmem:[%s968_s1 + $0x64] ss:$16 sps:$4 sm:$0xff] (!%p174_p3)  }
   0xb   : > { %v755_v14 = vld [vmem:[%s968_s1 + $0x6c] ss:$16 sps:$4 sm:$0xff] (!%p174_p3)   ;;  %v757_v15 = vld [vmem:[%s968_s1 + $0x60] ss:$16 sps:$4 sm:$0xff] (!%p174_p3)   ;;  %v758_v16 = vld [vmem:[%s968_s1 + $0x68] ss:$16 sps:$4 sm:$0xff] (!%p174_p3)  }
   0xc   : > { %v759_v17 = vld [vmem:[%s968_s1 + $0x84] ss:$16 sps:$4 sm:$0xff] (!%p174_p3)   ;;  %v761_v18 = vld [vmem:[%s968_s1 + $0x8c] ss:$16 sps:$4 sm:$0xff] (!%p174_p3)   ;;  %v763_v19 = vld [vmem:[%s968_s1 + $0x80] ss:$16 sps:$4 sm:$0xff] (!%p174_p3)  }
   0xd   : > { %461 = vmatpush1.bf16.msra.mxu0 (!%p174_p3), %v745_v7  ;;  %504 = vmatpush1.bf16.msra.mxu1 (!%p174_p3), %v746_v8  ;;  %v764_v20 = vld [vmem:[%s968_s1 + $0x88] ss:$16 sps:$4 sm:$0xff] (!%p174_p3)   ;;  %v765_v21 = vld [vmem:[%s968_s1 + $0xa4] ss:$16 sps:$4 sm:$0xff] (!%p174_p3)   ;;  %v767_v22 = vld [vmem:[%s968_s1 + $0xac] ss:$16 sps:$4 sm:$0xff] (!%p174_p3)  }
   0xe   : > { %462 = vmatprep.subr.bf16.mxu0 %v747_v9  ;;  %505 = vmatprep.subr.bf16.mxu1 %v749_v10  ;;  %s976_s23 = smov (!%p212_p4, %s670_s23), 3  ;;  %v769_v23 = vld [vmem:[%s968_s1 + $0xa0] ss:$16 sps:$4 sm:$0xff]   ;;  %v770_v24 = vld [vmem:[%s968_s1 + $0xa8] ss:$16 sps:$4 sm:$0xff]   ;;  %v279_v37 = vshrl.u32 %v278_v36, 7 }
   0xf   : > { %v771_v25 = vld [vmem:[%s968_s1 + $0xc4] ss:$16 sps:$4 sm:$0xff]   ;;  %v773_v26 = vld [vmem:[%s968_s1 + $0xcc] ss:$16 sps:$4 sm:$0xff]   ;;  %s671_s22 = sshll.u32 %s976_s23, 3  ;;  %s709_s17 = sshll.u32 %s976_s23, 5 }
  0x10   : > { %v775_v27 = vld [vmem:[%s968_s1 + $0xc0] ss:$16 sps:$4 sm:$0xff]   ;;  %v776_v28 = vld [vmem:[%s968_s1 + $0xc8] ss:$16 sps:$4 sm:$0xff]   ;;  %v777_v29 = vld [vmem:[%s968_s1 + $0xe4] ss:$16 sps:$4 sm:$0xff]   ;;  %s215_s6 = scalar_lea.vmem %s967_s0, %s671_s22  ;;  %s237_s20 = scalar_lea.vmem %s970_s3, %s709_s17 }
  0x11   : > { %463 = vmatpush1.bf16.msra.mxu0 %v751_v11  ;;  %506 = vmatpush1.bf16.msra.mxu1 %v752_v12  ;;  %v779_v30 = vld [vmem:[%s968_s1 + $0xec] ss:$16 sps:$4 sm:$0xff]   ;;  %v781_v31 = vld [vmem:[%s968_s1 + $0xe0] ss:$16 sps:$4 sm:$0xff]   ;;  %v782_v32 = vld [vmem:[%s968_s1 + $0xe8] ss:$16 sps:$4 sm:$0xff]  }
  0x12   : > { %464 = vmatprep.subr.bf16.mxu0 %v753_v13  ;;  %507 = vmatprep.subr.bf16.mxu1 %v755_v14  ;;  %v241_v33 = vld [vmem:[%s215_s6] sm:$0xff]  ;;  %v242_v34 = vld [vmem:[%s215_s6 + $0x8] sm:$0xff]  ;;  %v280_v38 = vsub.s32 0, %v279_v37  ;;  %v288_v39 = vsub.s32 2, %v279_v37  ;;  %v284_v41 = vsub.s32 1, %v279_v37  ;;  %v292_v42 = vsub.s32 3, %v279_v37 }
  0x13   : > { %v243_v35 = vpack.c.bf16 %v242_v34, %v241_v33  ;;  %v276_v40 = vld [vmem:[%s969_s2] sm:$0xf] }
  0x14   : > { %v281_v43 = vrot.slane %v276_v40, %v280_v38  ;;  %v289_v44 = vrot.slane %v276_v40, %v288_v39  ;;  %v285_v45 = vrot.slane %v276_v40, %v284_v41  ;;  %v293_v46 = vrot.slane %v276_v40, %v292_v42 }
  0x15   : > { %465 = vmatpush1.bf16.msra.mxu0 %v757_v15  ;;  %508 = vmatpush1.bf16.msra.mxu1 %v758_v16 }
  0x16   : > { %466 = vmatprep.subr.bf16.mxu0 %v759_v17  ;;  %509 = vmatprep.subr.bf16.mxu1 %v761_v18 }
  0x19   : > { %467 = vmatpush1.bf16.msra.mxu0 %v763_v19  ;;  %510 = vmatpush1.bf16.msra.mxu1 %v764_v20 }
  0x1a   : > { %468 = vmatprep.subr.bf16.mxu0 %v765_v21  ;;  %511 = vmatprep.subr.bf16.mxu1 %v767_v22 }
  0x1d   : > { %469 = vmatpush1.bf16.msra.mxu0 %v769_v23  ;;  %512 = vmatpush1.bf16.msra.mxu1 %v770_v24 }
  0x1e   : > { %470 = vmatprep.subr.bf16.mxu0 %v771_v25  ;;  %513 = vmatprep.subr.bf16.mxu1 %v773_v26 }
  0x21   : > { %471 = vmatpush1.bf16.msra.mxu0 %v775_v27  ;;  %514 = vmatpush1.bf16.msra.mxu1 %v776_v28 }
  0x22   : > { %472 = vmatprep.subr.bf16.mxu0 %v777_v29  ;;  %515 = vmatprep.subr.bf16.mxu1 %v779_v30 }
  0x25   : > { %473 = vmatpush1.bf16.msra.mxu0 %v781_v31  ;;  %516 = vmatpush1.bf16.msra.mxu1 %v782_v32 }
  0x28   : > { %491 = vmatmul.mubr.bf16.vlgmr.msra.gmra.mrb[0].mxu0 %v243_v35  ;;  %534 = vmatmul.mubr.bf16.vlgmr.msra.gmra.mrb[0].mxu1 %v243_v35 }
  0xfb   : > { %v492_v47 = vpop.f32.mrb[0].mxu0  ;;  %v535_v48 = vpop.f32.mrb[0].mxu1 }
  0xfc   : > { %v493_v49 = vadd.f32 %v492_v47, %v281_v43  ;;  %v536_v50 = vadd.f32 %v535_v48, %v289_v44  ;;  %v494_v51 = vpop.f32.mrb[1].mxu0  ;;  %v537_v52 = vpop.f32.mrb[1].mxu1 }
  0xfd   : > { %v495_v53 = vadd.f32 %v494_v51, %v285_v45  ;;  %v538_v54 = vadd.f32 %v537_v52, %v293_v46  ;;  %v496_v55 = vpop.f32.mrb[2].mxu0  ;;  %v539_v56 = vpop.f32.mrb[2].mxu1 }
  0xfe   : > { %544 = vst [vmem:[%s237_s20] sm:$0xff] %v493_v49  ;;  %546 = vst [vmem:[%s237_s20 + $0x10] sm:$0xff] %v536_v50  ;;  %v497_v57 = vadd.f32 %v496_v55, %v281_v43  ;;  %v540_v58 = vadd.f32 %v539_v56, %v289_v44  ;;  %v498_v59 = vpop.f32.mrb[3].mxu0  ;;  %v541_v60 = vpop.f32.mrb[3].mxu1 }
  0xff   : > { %545 = vst [vmem:[%s237_s20 + $0x8] sm:$0xff] %v495_v53  ;;  %547 = vst [vmem:[%s237_s20 + $0x18] sm:$0xff] %v538_v54  ;;  %v499_v61 = vadd.f32 %v498_v59, %v285_v45  ;;  %v542_v62 = vadd.f32 %v541_v60, %v293_v46 }
 0x100   : > { %548 = vst [vmem:[%s237_s20 + $0x20] sm:$0xff] %v497_v57  ;;  %550 = vst [vmem:[%s237_s20 + $0x30] sm:$0xff] %v540_v58 }
 0x101   : > { %549 = vst [vmem:[%s237_s20 + $0x28] sm:$0xff] %v499_v61  ;;  %551 = vst [vmem:[%s237_s20 + $0x38] sm:$0xff] %v542_v62 }
 0x102 PF: > { %s13_s14 = sadd.s32 1, %s805_s14   ;;  %s971_s12 = smov %s801_s13 }
 0x103   : > { %p10_p5 = scmp.ge.s32.totalorder %s13_s14, 4   ;;  %s972_s13 = smov %s974_s15 }
 0x105   :  { %12 = sbr.rel (!%p10_p5) target bundleno = 2 (0x2), region = 68 }

// kernel: caption_decoder_forward.5
= control target key start
LH: loop header
LB: loop body
LE: loop exit
PB: predicated region body
PF: predicated region fallthrough
CT: control target
= control target key end

     0   :  { %s642_s12 = smov 0   ;;  %s644_s13 = smov 0   ;;  %s730_s0 = inlined_call_operand.vmem [shape: bf16[32,128], index: 0, kind: input, shape index: {}]   ;;  %s731_s1 = inlined_call_operand.vmem [shape: bf16[128,256], index: 1, kind: input, shape index: {}]   ;;  %s732_s2 = inlined_call_operand.vmem [shape: f32[1,256], index: 2, kind: input, shape index: {}]   ;;  %s733_s3 = inlined_call_operand.vmem [shape: f32[32,256], index: 3, kind: output, shape index: {}]  }
   0x1   :  { %s646_s14 = smov 0  }
   0x2 LB: > { %s22_s15 = sadd.s32 1, %s615_s13  ;;  %p521_p0 = scmp.ge.s32.totalorder %s619_s14, 1  ;;  %s619_s14 = sphi %s646_s14, %s13_s14   ;;  %s615_s13 = sphi %s644_s13, %s735_s13   ;;  %s611_s12 = sphi %s642_s12, %s734_s12  }
   0x3   : > { %p23_p1 = scmp.ge.s32.totalorder %s22_s15, 2  ;;  %p173_p2 = scmp.lt.s32.totalorder %s619_s14, 3 }
   0x5   : > { %s737_s15 = smov (%p23_p1, %s22_s15), 0  ;;  %p174_p3 = pnand %p521_p0, %p173_p2 }
   0x6   : > { %v572_v0 = vld [vmem:[%s731_s1 + $0x4] ss:$8 sps:$4 sm:$0xff] (!%p174_p3)   ;;  %s522_s18 = sshll.u32 (!%p174_p3), %s611_s12, 1  ;;  %v574_v1 = vld [vmem:[%s731_s1] ss:$8 sps:$4 sm:$0xff] (!%p174_p3)   ;;  %v621_v2 = vmov (!%p174_p3), 0   ;;  %v261_v18 = vlaneseq (!%p174_p3) }
   0x7   : > { %177 = sbr.rel (%p174_p3) target bundleno = 257 (0x101), region = 32  ;;  %389 = vmatprep.mubr.bf16.mxu0 (!%p174_p3), %v621_v2  ;;  %p212_p4 = scmp.lt.s32.totalorder (!%p174_p3), %s522_s18, 3  ;;  %357 = vmatprep.subr.bf16.mxu0 (!%p174_p3), %v572_v0  ;;  %v575_v3 = vld [vmem:[%s731_s1 + $0x14] ss:$8 sps:$4 sm:$0xff] (!%p174_p3)   ;;  %v577_v4 = vld [vmem:[%s731_s1 + $0x10] ss:$8 sps:$4 sm:$0xff] (!%p174_p3)  }
   0x8   : > { %358 = vmatpush1.bf16.msra.mxu0 (!%p174_p3), %v574_v1  ;;  %v578_v5 = vld [vmem:[%s731_s1 + $0x24] ss:$8 sps:$4 sm:$0xff] (!%p174_p3)   ;;  %v580_v6 = vld [vmem:[%s731_s1 + $0x20] ss:$8 sps:$4 sm:$0xff] (!%p174_p3)   ;;  %v581_v7 = vld [vmem:[%s731_s1 + $0x34] ss:$8 sps:$4 sm:$0xff] (!%p174_p3)  }
   0x9   : > { %359 = vmatprep.subr.bf16.mxu0 (!%p174_p3), %v575_v3  ;;  %v583_v8 = vld [vmem:[%s731_s1 + $0x30] ss:$8 sps:$4 sm:$0xff] (!%p174_p3)   ;;  %v584_v9 = vld [vmem:[%s731_s1 + $0x44] ss:$8 sps:$4 sm:$0xff] (!%p174_p3)   ;;  %v586_v10 = vld [vmem:[%s731_s1 + $0x40] ss:$8 sps:$4 sm:$0xff] (!%p174_p3)  }
   0xa   : > { %v587_v11 = vld [vmem:[%s731_s1 + $0x54] ss:$8 sps:$4 sm:$0xff] (!%p174_p3)   ;;  %v589_v12 = vld [vmem:[%s731_s1 + $0x50] ss:$8 sps:$4 sm:$0xff] (!%p174_p3)   ;;  %v590_v13 = vld [vmem:[%s731_s1 + $0x64] ss:$8 sps:$4 sm:$0xff] (!%p174_p3)  }
   0xb   : > { %v592_v14 = vld [vmem:[%s731_s1 + $0x60] ss:$8 sps:$4 sm:$0xff] (!%p174_p3)   ;;  %v593_v15 = vld [vmem:[%s731_s1 + $0x74] ss:$8 sps:$4 sm:$0xff] (!%p174_p3)   ;;  %v595_v16 = vld [vmem:[%s731_s1 + $0x70] ss:$8 sps:$4 sm:$0xff] (!%p174_p3)  }
   0xc   : > { %360 = vmatpush1.bf16.msra.mxu0 (!%p174_p3), %v577_v4  ;;  %v262_v19 = vshrl.u32 (!%p174_p3), %v261_v18, 7  ;;  %v259_v21 = vld [vmem:[%s732_s2] sm:$0x3] (!%p174_p3) }
   0xd   : > { %361 = vmatprep.subr.bf16.mxu0 (!%p174_p3), %v578_v5 }
   0xe   : > { %s739_s18 = smov (!%p212_p4, %s522_s18), 3  ;;  %v263_v20 = vsub.s32 0, %v262_v19  ;;  %v267_v22 = vsub.s32 1, %v262_v19 }
   0xf   : > { %s523_s27 = sshll.u32 %s739_s18, 2  ;;  %s546_s5 = sshll.u32 %s739_s18, 4 }
  0x10   : > { %s215_s7 = scalar_lea.vmem %s730_s0, %s523_s27  ;;  %362 = vmatpush1.bf16.msra.mxu0 %v580_v6  ;;  %v264_v23 = vrot.slane %v259_v21, %v263_v20  ;;  %v268_v24 = vrot.slane %v259_v21, %v267_v22  ;;  %s237_s9 = scalar_lea.vmem %s733_s3, %s546_s5 }
  0x11   : > { %363 = vmatprep.subr.bf16.mxu0 %v581_v7  ;;  %v596_v17 = vld [vmem:[%s215_s7] sm:$0xff]  }
  0x14   : > { %364 = vmatpush1.bf16.msra.mxu0 %v583_v8 }
  0x15   : > { %365 = vmatprep.subr.bf16.mxu0 %v584_v9 }
  0x18   : > { %366 = vmatpush1.bf16.msra.mxu0 %v586_v10 }
  0x19   : > { %367 = vmatprep.subr.bf16.mxu0 %v587_v11 }
  0x1c   : > { %368 = vmatpush1.bf16.msra.mxu0 %v589_v12 }
  0x1d   : > { %369 = vmatprep.subr.bf16.mxu0 %v590_v13 }
  0x20   : > { %370 = vmatpush1.bf16.msra.mxu0 %v592_v14 }
  0x21   : > { %371 = vmatprep.subr.bf16.mxu0 %v593_v15 }
  0x24   : > { %372 = vmatpush1.bf16.msra.mxu0 %v595_v16 }
  0x27   : > { %390 = vmatmul.mubr.bf16.vlgmr.msra.gmra.mrb[0].mxu0 %v596_v17 }
  0xfa   : > { %v391_v25 = vpop.f32.mrb[0].mxu0 }
  0xfb   : > { %v392_v26 = vadd.f32 %v391_v25, %v264_v23  ;;  %v393_v27 = vpop.f32.mrb[1].mxu0 }
  0xfc   : > { %v394_v28 = vadd.f32 %v393_v27, %v268_v24  ;;  %v395_v29 = vpop.f32.mrb[2].mxu0 }
  0xfd   : > { %400 = vst [vmem:[%s237_s9] sm:$0xff] %v392_v26  ;;  %v396_v30 = vadd.f32 %v395_v29, %v264_v23  ;;  %v397_v31 = vpop.f32.mrb[3].mxu0 }
  0xfe   : > { %401 = vst [vmem:[%s237_s9 + $0x8] sm:$0xff] %v394_v28  ;;  %v398_v32 = vadd.f32 %v397_v31, %v268_v24 }
  0xff   : > { %402 = vst [vmem:[%s237_s9 + $0x10] sm:$0xff] %v396_v30 }
 0x100   : > { %403 = vst [vmem:[%s237_s9 + $0x18] sm:$0xff] %v398_v32 }
 0x101 PF: > { %s13_s14 = sadd.s32 1, %s619_s14   ;;  %s734_s12 = smov %s615_s13 }
 0x102   : > { %p10_p5 = scmp.ge.s32.totalorder %s13_s14, 4   ;;  %s735_s13 = smov %s737_s15 }
 0x104   :  { %12 = sbr.rel (!%p10_p5) target bundleno = 2 (0x2), region = 68 }

// kernel: caption_decoder_forward.4
= control target key start
LH: loop header
LB: loop body
LE: loop exit
PB: predicated region body
PF: predicated region fallthrough
CT: control target
= control target key end

     0   :  { %v907_v1 = vmov 0   ;;  %v908_v33 = vmov 0.0|0.0   ;;  %s1114_s1 = inlined_call_operand.vmem [shape: bf16[128,512], index: 1, kind: input, shape index: {}]   ;;  %s1115_s0 = inlined_call_operand.vmem [shape: f32[2,16,512], index: 0, kind: input, shape index: {}]   ;;  %s1116_s2 = inlined_call_operand.vmem [shape: bf16[2,16,128], index: 2, kind: output, shape index: {}]  }
   0x1   :  { %v927_v0 = vld [vmem:[%s1114_s1 + $0x4] ss:$16 sps:$4 sm:$0xff]   ;;  %257 = vmatprep.mubr.bf16.mxu0 %v907_v1  ;;  %300 = vmatprep.mubr.bf16.mxu1 %v907_v1  ;;  %v934_v2 = vld [vmem:[%s1114_s1] ss:$16 sps:$4 sm:$0xff]   ;;  %v824_v4 = vld [vmem:[%s1114_s1 + $0xc] ss:$16 sps:$4 sm:$0xff]  }
   0x2   :  { %225 = vmatprep.subr.bf16.mxu0 %v927_v0  ;;  %v940_v3 = vld [vmem:[%s1114_s1 + $0x24] ss:$16 sps:$4 sm:$0xff]   ;;  %v949_v5 = vld [vmem:[%s1114_s1 + $0x20] ss:$16 sps:$4 sm:$0xff]   ;;  %v954_v6 = vld [vmem:[%s1114_s1 + $0x8] ss:$16 sps:$4 sm:$0xff]   ;;  %268 = vmatprep.subr.bf16.mxu1 %v824_v4 }
   0x3   :  { %226 = vmatpush1.bf16.msra.mxu0 %v934_v2  ;;  %v960_v7 = vld [vmem:[%s1114_s1 + $0x44] ss:$16 sps:$4 sm:$0xff]   ;;  %v830_v8 = vld [vmem:[%s1114_s1 + $0x2c] ss:$16 sps:$4 sm:$0xff]   ;;  %269 = vmatpush1.bf16.msra.mxu1 %v954_v6  ;;  %v969_v9 = vld [vmem:[%s1114_s1 + $0x28] ss:$16 sps:$4 sm:$0xff]  }
   0x4   :  { %227 = vmatprep.subr.bf16.mxu0 %v940_v3  ;;  %270 = vmatprep.subr.bf16.mxu1 %v830_v8  ;;  %v832_v10 = vld [vmem:[%s1114_s1 + $0x40] ss:$16 sps:$4 sm:$0xff]   ;;  %v834_v11 = vld [vmem:[%s1114_s1 + $0x64] ss:$16 sps:$4 sm:$0xff]   ;;  %v836_v12 = vld [vmem:[%s1114_s1 + $0x4c] ss:$16 sps:$4 sm:$0xff]  }
   0x5   :  { %v839_v13 = vld [vmem:[%s1114_s1 + $0x48] ss:$16 sps:$4 sm:$0xff]   ;;  %v838_v14 = vld [vmem:[%s1114_s1 + $0x60] ss:$16 sps:$4 sm:$0xff]   ;;  %v842_v15 = vld [vmem:[%s1114_s1 + $0x6c] ss:$16 sps:$4 sm:$0xff]  }
   0x6   :  { %v840_v16 = vld [vmem:[%s1114_s1 + $0x84] ss:$16 sps:$4 sm:$0xff]   ;;  %v844_v17 = vld [vmem:[%s1114_s1 + $0x80] ss:$16 sps:$4 sm:$0xff]   ;;  %v845_v18 = vld [vmem:[%s1114_s1 + $0x68] ss:$16 sps:$4 sm:$0xff]  }
   0x7   :  { %228 = vmatpush1.bf16.msra.mxu0 %v949_v5  ;;  %271 = vmatpush1.bf16.msra.mxu1 %v969_v9  ;;  %v848_v19 = vld [vmem:[%s1114_s1 + $0x8c] ss:$16 sps:$4 sm:$0xff]   ;;  %v846_v20 = vld [vmem:[%s1114_s1 + $0xa4] ss:$16 sps:$4 sm:$0xff]   ;;  %v851_v21 = vld [vmem:[%s1114_s1 + $0x88] ss:$16 sps:$4 sm:$0xff]  }
   0x8   :  { %229 = vmatprep.subr.bf16.mxu0 %v960_v7  ;;  %272 = vmatprep.subr.bf16.mxu1 %v836_v12  ;;  %v850_v22 = vld [vmem:[%s1114_s1 + $0xa0] ss:$16 sps:$4 sm:$0xff]   ;;  %v854_v23 = vld [vmem:[%s1114_s1 + $0xac] ss:$16 sps:$4 sm:$0xff]   ;;  %v852_v24 = vld [vmem:[%s1114_s1 + $0xc4] ss:$16 sps:$4 sm:$0xff]  }
   0x9   :  { %v857_v25 = vld [vmem:[%s1114_s1 + $0xa8] ss:$16 sps:$4 sm:$0xff]   ;;  %v856_v26 = vld [vmem:[%s1114_s1 + $0xc0] ss:$16 sps:$4 sm:$0xff]   ;;  %v860_v27 = vld [vmem:[%s1114_s1 + $0xcc] ss:$16 sps:$4 sm:$0xff]  }
   0xa   :  { %v858_v28 = vld [vmem:[%s1114_s1 + $0xe4] ss:$16 sps:$4 sm:$0xff]   ;;  %v863_v29 = vld [vmem:[%s1114_s1 + $0xc8] ss:$16 sps:$4 sm:$0xff]   ;;  %v862_v30 = vld [vmem:[%s1114_s1 + $0xe0] ss:$16 sps:$4 sm:$0xff]  }
   0xb   :  { %230 = vmatpush1.bf16.msra.mxu0 %v832_v10  ;;  %273 = vmatpush1.bf16.msra.mxu1 %v839_v13  ;;  %v864_v31 = vld [vmem:[%s1114_s1 + $0xec] ss:$16 sps:$4 sm:$0xff]   ;;  %v866_v32 = vld [vmem:[%s1114_s1 + $0xe8] ss:$16 sps:$4 sm:$0xff]   ;;  %v24_v34 = vld [vmem:[%s1115_s0] sm:$0xff] }
   0xc   :  { %231 = vmatprep.subr.bf16.mxu0 %v834_v11  ;;  %274 = vmatprep.subr.bf16.mxu1 %v842_v15  ;;  %v25_v35 = vld [vmem:[%s1115_s0 + $0x8] sm:$0xff]  ;;  %v28_v37 = vld [vmem:[%s1115_s0 + $0x20] sm:$0xff]  ;;  %v26_v43 = vld [vmem:[%s1115_s0 + $0x10] sm:$0xff] }
   0xd   :  { %v29_v40 = vld [vmem:[%s1115_s0 + $0x28] sm:$0xff]  ;;  %v30_v51 = vld [vmem:[%s1115_s0 + $0x30] sm:$0xff]  ;;  %v27_v57 = vld [vmem:[%s1115_s0 + $0x18] sm:$0xff] }
   0xe   :  { %v31_v59 = vld [vmem:[%s1115_s0 + $0x38] sm:$0xff] }
   0xf   :  { %232 = vmatpush1.bf16.msra.mxu0 %v838_v14  ;;  %275 = vmatpush1.bf16.msra.mxu1 %v845_v18 }
  0x10   :  { %233 = vmatprep.subr.bf16.mxu0 %v840_v16  ;;  %276 = vmatprep.subr.bf16.mxu1 %v848_v19 }
  0x13   :  { %234 = vmatpush1.bf16.msra.mxu0 %v844_v17  ;;  %277 = vmatpush1.bf16.msra.mxu1 %v851_v21 }
  0x14   :  { %235 = vmatprep.subr.bf16.mxu0 %v846_v20  ;;  %278 = vmatprep.subr.bf16.mxu1 %v854_v23 }
  0x17   :  { %236 = vmatpush1.bf16.msra.mxu0 %v850_v22  ;;  %279 = vmatpush1.bf16.msra.mxu1 %v857_v25 }
  0x18   :  { %237 = vmatprep.subr.bf16.mxu0 %v852_v24  ;;  %280 = vmatprep.subr.bf16.mxu1 %v860_v27 }
  0x1b   :  { %238 = vmatpush1.bf16.msra.mxu0 %v856_v26  ;;  %281 = vmatpush1.bf16.msra.mxu1 %v863_v29 }
  0x1c   :  { %239 = vmatprep.subr.bf16.mxu0 %v858_v28  ;;  %282 = vmatprep.subr.bf16.mxu1 %v864_v31 }
  0x1f   :  { %240 = vmatpush1.bf16.msra.mxu0 %v862_v30  ;;  %283 = vmatpush1.bf16.msra.mxu1 %v866_v32 }
  0x20   :  { %575 = vmatprep.subr.bf16.mxu0 %v927_v0  ;;  %618 = vmatprep.subr.bf16.mxu1 %v824_v4 }
  0x22   :  { %258 = vmatmul.mubr.bf16.vlgmr.msra.gmra.mrb[0].mxu0 %v908_v33  ;;  %301 = vmatmul.mubr.bf16.vlgmr.msra.gmra.mrb[0].mxu1 %v908_v33 }
  0x23   :  { %576 = vmatpush1.bf16.msra.mxu0 %v934_v2  ;;  %607 = vmatprep.mubr.bf16.mxu0 %v907_v1 }
  0x24   :  { %577 = vmatprep.subr.bf16.mxu0 %v940_v3  ;;  %619 = vmatpush1.bf16.msra.mxu1 %v954_v6 }
  0x25   :  { %650 = vmatprep.mubr.bf16.mxu1 %v907_v1  ;;  %620 = vmatprep.subr.bf16.mxu1 %v830_v8 }
  0x27   :  { %578 = vmatpush1.bf16.msra.mxu0 %v949_v5 }
  0x28   :  { %579 = vmatprep.subr.bf16.mxu0 %v960_v7  ;;  %621 = vmatpush1.bf16.msra.mxu1 %v969_v9 }
  0x29   :  { %622 = vmatprep.subr.bf16.mxu1 %v836_v12 }
  0x2b   :  { %580 = vmatpush1.bf16.msra.mxu0 %v832_v10 }
  0x2c   :  { %581 = vmatprep.subr.bf16.mxu0 %v834_v11  ;;  %623 = vmatpush1.bf16.msra.mxu1 %v839_v13 }
  0x2d   :  { %624 = vmatprep.subr.bf16.mxu1 %v842_v15 }
  0x2f   :  { %582 = vmatpush1.bf16.msra.mxu0 %v838_v14 }
  0x30   :  { %583 = vmatprep.subr.bf16.mxu0 %v840_v16  ;;  %625 = vmatpush1.bf16.msra.mxu1 %v845_v18 }
  0x31   :  { %626 = vmatprep.subr.bf16.mxu1 %v848_v19 }
  0x33   :  { %584 = vmatpush1.bf16.msra.mxu0 %v844_v17 }
  0x34   :  { %585 = vmatprep.subr.bf16.mxu0 %v846_v20  ;;  %627 = vmatpush1.bf16.msra.mxu1 %v851_v21 }
  0x35   :  { %628 = vmatprep.subr.bf16.mxu1 %v854_v23 }
  0x37   :  { %586 = vmatpush1.bf16.msra.mxu0 %v850_v22 }
  0x38   :  { %587 = vmatprep.subr.bf16.mxu0 %v852_v24  ;;  %629 = vmatpush1.bf16.msra.mxu1 %v857_v25 }
  0x39   :  { %630 = vmatprep.subr.bf16.mxu1 %v860_v27 }
  0x3b   :  { %588 = vmatpush1.bf16.msra.mxu0 %v856_v26 }
  0x3c   :  { %589 = vmatprep.subr.bf16.mxu0 %v858_v28  ;;  %631 = vmatpush1.bf16.msra.mxu1 %v863_v29 }
  0x3d   :  { %632 = vmatprep.subr.bf16.mxu1 %v864_v31  ;;  %v758_v31 = vld [vmem:[%s1115_s0 + $0x40] sm:$0xff] }
  0x3f   :  { %590 = vmatpush1.bf16.msra.mxu0 %v862_v30 }
  0x40   :  { %633 = vmatpush1.bf16.msra.mxu1 %v866_v32  ;;  %v759_v32 = vld [vmem:[%s1115_s0 + $0x48] sm:$0xff] }
  0xf5   :  { %v259_v36 = vpop.f32.mrb[0].mxu0  ;;  %v302_v47 = vpop.f32.mrb[0].mxu1 }
  0xf6   :  { %v311_v38 = vadd.f32 %v259_v36, %v24_v34  ;;  %v261_v39 = vpop.f32.mrb[1].mxu0  ;;  %v304_v50 = vpop.f32.mrb[1].mxu1  ;;  %v313_v53 = vadd.f32 %v302_v47, %v26_v43 }
  0xf7   :  { %v312_v41 = vadd.f32 %v261_v39, %v25_v35  ;;  %v263_v42 = vpop.f32.mrb[2].mxu0  ;;  %v306_v54 = vpop.f32.mrb[2].mxu1  ;;  %v314_v60 = vadd.f32 %v304_v50, %v27_v57  ;;  %v762_v35 = vld [vmem:[%s1115_s0 + $0x60] sm:$0xff]  ;;  %v763_v39 = vld [vmem:[%s1115_s0 + $0x68] sm:$0xff]  ;;  %v765_v57 = vld [vmem:[%s1115_s0 + $0x78] sm:$0xff] }
  0xf8   :  { %v319_v44 = vmul.f32 0.5, %v311_v38  ;;  %v315_v45 = vadd.f32 %v263_v42, %v28_v37  ;;  %v265_v46 = vpop.f32.mrb[3].mxu0  ;;  %v308_v56 = vpop.f32.mrb[3].mxu1  ;;  %v317_v58 = vadd.f32 %v306_v54, %v30_v51 }
  0xf9   :  { %v327_v48 = vmul.f32 0.5, %v312_v41  ;;  %v316_v49 = vadd.f32 %v265_v46, %v29_v40  ;;  %v318_v61 = vadd.f32 %v308_v56, %v31_v59  ;;  %v337_v62 = vmul.f32 0.5, %v314_v60  ;;  %v760_v40 = vld [vmem:[%s1115_s0 + $0x50] sm:$0xff] }
  0xfa   :  { %867 = vtanh.f32 %v319_v44  ;;  %v320_v52 = vmul.f32 0.5, %v315_v45 }
  0xfb   :  { %869 = vtanh.f32 %v327_v48  ;;  %v328_v55 = vmul.f32 0.5, %v316_v49  ;;  %v338_v0 = vmul.f32 0.5, %v318_v61 }
  0xfc   :  { %871 = vtanh.f32 %v320_v52  ;;  %v764_v52 = vld [vmem:[%s1115_s0 + $0x70] sm:$0xff] }
  0xfd   :  { %873 = vtanh.f32 %v328_v55 }
  0xfe   :  { %875 = vtanh.f32 %v313_v53  ;;  %v761_v53 = vld [vmem:[%s1115_s0 + $0x58] sm:$0xff] }
  0xff   :  { %877 = vtanh.f32 %v317_v58 }
 0x100   :  { %879 = vtanh.f32 %v337_v62 }
 0x101   :  { %881 = vtanh.f32 %v338_v0 }
 0x104   :  { %v868_v63 = vpop.eup %867 }
 0x105   :  { %v870_v1 = vpop.eup %869  ;;  %v323_v2 = vadd.f32 1.0, %v868_v63 }
 0x106   :  { %v872_v3 = vpop.eup %871  ;;  %v331_v4 = vadd.f32 1.0, %v870_v1 }
 0x107   :  { %v874_v5 = vpop.eup %873  ;;  %v325_v6 = vmul.f32 0.5, %v323_v2  ;;  %v324_v7 = vadd.f32 1.0, %v872_v3 }
 0x108   :  { %v876_v8 = vpop.eup %875  ;;  %v333_v9 = vmul.f32 0.5, %v331_v4  ;;  %v332_v10 = vadd.f32 1.0, %v874_v5 }
 0x109   :  { %v326_v11 = vmul.f32 0.5, %v324_v7  ;;  %v347_v12 = vmul.f32 %v876_v8, %v325_v6  ;;  %v878_v13 = vpop.eup %877 }
 0x10a   :  { %v345_v14 = vmul.f32 0.0, %v333_v9  ;;  %v334_v15 = vmul.f32 0.5, %v332_v10  ;;  %v880_v20 = vpop.eup %879 }
 0x10b   :  { %v348_v16 = vmul.f32 %v878_v13, %v326_v11  ;;  %v882_v21 = vpop.eup %881  ;;  %v341_v22 = vadd.f32 1.0, %v880_v20 }
 0x10c   :  { %v346_v17 = vmul.f32 0.0, %v334_v15  ;;  %v1076_v18 = vadd.f32 %v347_v12, %v345_v14  ;;  %v342_v23 = vadd.f32 1.0, %v882_v21 }
 0x10d   :  { %v343_v25 = vmul.f32 0.5, %v341_v22 }
 0x10e   :  { %883 = vtanh.f32 %v1076_v18  ;;  %v1079_v19 = vadd.f32 %v348_v16, %v346_v17  ;;  %v344_v26 = vmul.f32 0.5, %v342_v23 }
 0x110   :  { %885 = vtanh.f32 %v1079_v19 }
 0x118   :  { %v884_v24 = vpop.eup %883 }
 0x119   :  { %v353_v28 = vmul.f32 %v884_v24, %v343_v25 }
 0x11a   :  { %v886_v27 = vpop.eup %885 }
 0x11b   :  { %v354_v29 = vmul.f32 %v886_v27, %v344_v26 }
 0x11d   :  { %v809_v30 = vpack.c.bf16 %v354_v29, %v353_v28 }
 0x11f   :  { %608 = vmatmul.mubr.bf16.vlgmr.msra.gmra.mrb[4].mxu0 %v809_v30  ;;  %651 = vmatmul.mubr.bf16.vlgmr.msra.gmra.mrb[4].mxu1 %v809_v30  ;;  %810 = vst [vmem:[%s1116_s2] sm:$0xff] %v809_v30  }
 0x1f2   :  { %v609_v33 = vpop.f32.mrb[4].mxu0  ;;  %v652_v34 = vpop.f32.mrb[4].mxu1 }
 0x1f3   :  { %v661_v36 = vadd.f32 %v758_v31, %v609_v33  ;;  %v611_v37 = vpop.f32.mrb[5].mxu0  ;;  %v654_v38 = vpop.f32.mrb[5].mxu1  ;;  %v663_v50 = vadd.f32 %v760_v40, %v652_v34 }
 0x1f4   :  { %v662_v41 = vadd.f32 %v759_v32, %v611_v37  ;;  %v613_v42 = vpop.f32.mrb[6].mxu0  ;;  %v656_v43 = vpop.f32.mrb[6].mxu1  ;;  %v664_v56 = vadd.f32 %v761_v53, %v654_v38 }
 0x1f5   :  { %v669_v44 = vmul.f32 0.5, %v661_v36  ;;  %v665_v45 = vadd.f32 %v762_v35, %v613_v42  ;;  %v615_v46 = vpop.f32.mrb[7].mxu0  ;;  %v658_v47 = vpop.f32.mrb[7].mxu1  ;;  %v667_v55 = vadd.f32 %v764_v52, %v656_v43 }
 0x1f6   :  { %v677_v48 = vmul.f32 0.5, %v662_v41  ;;  %v666_v49 = vadd.f32 %v763_v39, %v615_v46  ;;  %v687_v58 = vmul.f32 0.5, %v664_v56  ;;  %v668_v59 = vadd.f32 %v765_v57, %v658_v47 }
 0x1f7   :  { %887 = vtanh.f32 %v669_v44  ;;  %v670_v51 = vmul.f32 0.5, %v665_v45 }
 0x1f8   :  { %889 = vtanh.f32 %v677_v48  ;;  %v678_v54 = vmul.f32 0.5, %v666_v49  ;;  %v688_v0 = vmul.f32 0.5, %v668_v59 }
 0x1f9   :  { %891 = vtanh.f32 %v670_v51 }
 0x1fa   :  { %893 = vtanh.f32 %v663_v50 }
 0x1fb   :  { %895 = vtanh.f32 %v678_v54 }
 0x1fc   :  { %897 = vtanh.f32 %v667_v55 }
 0x1fd   :  { %899 = vtanh.f32 %v687_v58 }
 0x1fe   :  { %901 = vtanh.f32 %v688_v0 }
 0x201   :  { %v888_v60 = vpop.eup %887 }
 0x202   :  { %v890_v61 = vpop.eup %889  ;;  %v673_v62 = vadd.f32 1.0, %v888_v60 }
 0x203   :  { %v681_v63 = vadd.f32 1.0, %v890_v61  ;;  %v892_v1 = vpop.eup %891 }
 0x204   :  { %v675_v2 = vmul.f32 0.5, %v673_v62  ;;  %v894_v3 = vpop.eup %893  ;;  %v674_v5 = vadd.f32 1.0, %v892_v1 }
 0x205   :  { %v683_v4 = vmul.f32 0.5, %v681_v63  ;;  %v896_v6 = vpop.eup %895 }
 0x206   :  { %v697_v7 = vmul.f32 %v894_v3, %v675_v2  ;;  %v676_v9 = vmul.f32 0.5, %v674_v5  ;;  %v682_v10 = vadd.f32 1.0, %v896_v6  ;;  %v898_v11 = vpop.eup %897 }
 0x207   :  { %v695_v8 = vmul.f32 %v683_v4, %v1076_v18  ;;  %v900_v16 = vpop.eup %899 }
 0x208   :  { %v684_v13 = vmul.f32 0.5, %v682_v10  ;;  %v698_v14 = vmul.f32 %v898_v11, %v676_v9  ;;  %v691_v20 = vadd.f32 1.0, %v900_v16  ;;  %v902_v21 = vpop.eup %901 }
 0x209   :  { %v699_v12 = vadd.f32 %v697_v7, %v695_v8  ;;  %v692_v23 = vadd.f32 1.0, %v902_v21 }
 0x20a   :  { %v696_v15 = vmul.f32 %v684_v13, %v1079_v19  ;;  %v693_v22 = vmul.f32 0.5, %v691_v20 }
 0x20b   :  { %903 = vtanh.f32 %v699_v12  ;;  %v694_v18 = vmul.f32 0.5, %v692_v23 }
 0x20c   :  { %v700_v17 = vadd.f32 %v698_v14, %v696_v15 }
 0x20e   :  { %905 = vtanh.f32 %v700_v17 }
 0x215   :  { %v904_v24 = vpop.eup %903 }
 0x216   :  { %v703_v25 = vmul.f32 %v904_v24, %v693_v22 }
 0x218   :  { %v906_v26 = vpop.eup %905 }
 0x219   :  { %v704_v27 = vmul.f32 %v906_v26, %v694_v18 }
 0x21b   :  { %v814_v28 = vpack.c.bf16 %v704_v27, %v703_v25 }
 0x21d   :  { %816 = vst [vmem:[%s1116_s2 + $0x8] sm:$0xff] %v814_v28  }

</bundles_post_ra>
